<compile_context>
chip_gen: v5e
topology: v5e:2x2
jax: 0.10.0
libtpu: 0.0.40
codegen_flags: <defaults>
</compile_context>

<pallas_src>
import numpy as np
import jax
import jax.numpy as jnp
from jax.experimental import pallas as pl
from jax.experimental.pallas import tpu as pltpu


# --------------------------------------------------------------------------
# DDPM schedule (register_schedule) -- plain numpy glue, deterministic.
# --------------------------------------------------------------------------
def make_beta_schedule(schedule, n_timestep, linear_start=1e-4, linear_end=2e-2):
    if schedule == "scaled_linear":
        betas = np.linspace(linear_start ** 0.5, linear_end ** 0.5,
                            n_timestep, dtype=np.float64) ** 2
    elif schedule == "linear":
        betas = np.linspace(linear_start, linear_end, n_timestep, dtype=np.float64)
    else:
        raise NotImplementedError(schedule)
    return betas


class DDPMSchedule:
    def __init__(self, timesteps=1000, beta_schedule="scaled_linear",
                 linear_start=1e-4, linear_end=2e-2, v_posterior=0.0,
                 parameterization="eps"):
        betas = make_beta_schedule(beta_schedule, timesteps, linear_start, linear_end)
        alphas = 1.0 - betas
        alphas_cumprod = np.cumprod(alphas, axis=0)
        alphas_cumprod_prev = np.append(1.0, alphas_cumprod[:-1])

        self.num_timesteps = int(timesteps)
        self.betas = jnp.asarray(betas, jnp.float32)
        self.alphas_cumprod = jnp.asarray(alphas_cumprod, jnp.float32)
        self.sqrt_alphas_cumprod = jnp.asarray(np.sqrt(alphas_cumprod), jnp.float32)
        self.sqrt_one_minus_alphas_cumprod = jnp.asarray(
            np.sqrt(1.0 - alphas_cumprod), jnp.float32)

        posterior_variance = ((1 - v_posterior) * betas *
                              (1.0 - alphas_cumprod_prev) / (1.0 - alphas_cumprod)
                              + v_posterior * betas)
        self.posterior_variance = jnp.asarray(posterior_variance, jnp.float32)

        if parameterization == "eps":
            with np.errstate(divide="ignore", invalid="ignore"):
                lvlb = betas ** 2 / (2 * posterior_variance * alphas
                                     * (1 - alphas_cumprod))
        else:
            raise NotImplementedError(parameterization)
        lvlb[0] = lvlb[1]
        self.lvlb_weights = jnp.asarray(lvlb, jnp.float32)
        assert not np.isnan(np.asarray(self.lvlb_weights)).any()


# --------------------------------------------------------------------------
# Fused Pallas kernel: q_sample -> toy diffusion model -> per-batch L2 loss.
#
# All of q_sample, the 1x1 channel mix and the "- noise" of the eps loss are folded
# (in glue) into one per-batch weight, so the kernel does one MXU matmul per tile:
#   d_b = [ a_b*W | b_b*W - I ] @ [x_b ; n_b] + temb_b       (= model_out - noise)
#   loss_b = sum(d_b^2) / (C*H*W)
# --------------------------------------------------------------------------
def _pick_hw_tile(hw):
    for t in (512, 256, 128):
        if hw % t == 0:
            return t
    return hw


def fused_p_losses_pallas(w_fold, t_col, xn):
    """w_fold: (B, C, 2C) f32   folded per-batch weight [a*W | b*W - I]
       t_col : (B, C, 1)  f32   timestep-embedding bias column
       xn    : (B, 2C, HW) f32  x_start rows stacked on noise rows
       returns (B,) f32 per-batch mean((model_out - noise)^2) over (C, H, W)."""
    B, C, twoC = w_fold.shape
    _, _, HW = xn.shape
    hw_tile = _pick_hw_tile(HW)
    n_j = HW // hw_tile
    inv_n = 1.0 / float(C * HW)

    def kernel(w_ref, t_ref, xn_ref, loss_ref):
        j = pl.program_id(1)

        @pl.when(j == 0)
        def _init():
            loss_ref[...] = jnp.zeros_like(loss_ref)

        # one MXU dot: (C, 2C) @ (2C, hw_tile) -> (C, hw_tile), f32 accumulate
        d = jnp.dot(w_ref[0], xn_ref[0],
                    preferred_element_type=jnp.float32) + t_ref[0]
        # XLU square-reduce; accumulate in the resident output block
        loss_ref[...] += jnp.sum(d * d)

        @pl.when(j == pl.num_programs(1) - 1)
        def _finalize():
            loss_ref[...] *= inv_n

    out = pl.pallas_call(
        kernel,
        out_shape=jax.ShapeDtypeStruct((B, 1, 128), jnp.float32),
        grid=(B, n_j),  # batch parallel (megacore), spatial tiles = reduction axis
        in_specs=[
            # per-batch weight & bias blocks stay resident across the spatial axis
            pl.BlockSpec((1, C, twoC), lambda b, j: (b, 0, 0)),
            pl.BlockSpec((1, C, 1), lambda b, j: (b, 0, 0)),
            # (1, 2C, hw_tile) = lane-dense (8, 128)-aligned tile, auto double-buffered
            pl.BlockSpec((1, twoC, hw_tile), lambda b, j: (b, 0, j)),
        ],
        out_specs=pl.BlockSpec((1, 1, 128), lambda b, j: (b, 0, 0)),
        compiler_params=pltpu.CompilerParams(
            dimension_semantics=("parallel", "arbitrary")),
    )(w_fold, t_col, xn)
    return out[:, 0, 0]


# --------------------------------------------------------------------------
# Glue: timestep embedding, weight folding, p_losses, DDPM.forward
# --------------------------------------------------------------------------
def timestep_embedding(t, dim, max_period=10000.0):
    half = dim // 2
    freqs = jnp.exp(-jnp.log(max_period) *
                    jnp.arange(half, dtype=jnp.float32) / half)
    args = t.astype(jnp.float32)[:, None] * freqs[None, :]
    return jnp.concatenate([jnp.cos(args), jnp.sin(args)], axis=-1)   # (B, dim)


def p_losses_per_batch_fused(params, sched, x, t, noise):
    """Per-batch mean((model_out - noise)^2, dims=[C,H,W]) via the fused Pallas kernel."""
    B, C, H, W = x.shape
    HW = H * W

    a = sched.sqrt_alphas_cumprod[t].astype(jnp.float32)                 # (B,)
    b = sched.sqrt_one_minus_alphas_cumprod[t].astype(jnp.float32)       # (B,)

    temb = timestep_embedding(t, params["temb_w"].shape[0])              # (B, E)
    tproj = (temb @ params["temb_w"] + params["temb_b"]).astype(jnp.float32)  # (B, C)

    W_mix = params["mix_w"].astype(jnp.float32)                          # (C, C)
    eye_c = jnp.eye(C, dtype=jnp.float32)

    # fold q_sample scales, channel mix and the "- noise" into one per-batch weight:
    #   model_out - noise = (a*W) @ x + (b*W - I) @ noise + temb_bias
    w_fold = jnp.concatenate(
        [a[:, None, None] * W_mix[None],
         b[:, None, None] * W_mix[None] - eye_c[None]], axis=-1)         # (B, C, 2C)
    t_col = tproj[:, :, None]                                            # (B, C, 1)

    # stacked RHS: x rows on top of noise rows -> (B, 2C, HW)
    # TODO(synk): at real latent sizes feed this as bf16 to halve HBM read traffic.
    xn = jnp.concatenate([x.reshape(B, C, HW), noise.reshape(B, C, HW)],
                         axis=1).astype(jnp.float32)

    return fused_p_losses_pallas(w_fold, t_col, xn)                      # (B,)


def p_losses_per_batch_ref(params, sched, x, t, noise):
    """Pure-JAX reference of the same math (q_sample -> toy model -> per-batch l2)."""
    sac = sched.sqrt_alphas_cumprod[t][:, None, None, None]
    som = sched.sqrt_one_minus_alphas_cumprod[t][:, None, None, None]
    x_noisy = sac * x + som * noise
    temb = timestep_embedding(t, params["temb_w"].shape[0])
    tproj = temb @ params["temb_w"] + params["temb_b"]                   # (B, C)
    model_out = jnp.einsum("oc,bchw->bohw", params["mix_w"], x_noisy) \
        + tproj[:, :, None, None]
    d = model_out - noise
    return jnp.mean(d * d, axis=(1, 2, 3))


def ddpm_forward(params, sched, x, key,
                 l_simple_weight=1.0, original_elbo_weight=0.0):
    """Equivalent of DDPM.forward(x): sample t, run p_losses (eps / l2)."""
    B = x.shape[0]
    k_t, k_noise = jax.random.split(key)

    t = jax.random.randint(k_t, (B,), 0, sched.num_timesteps)            # torch.randint
    noise = jax.random.normal(k_noise, x.shape, dtype=jnp.float32)       # randn_like

    per_batch = p_losses_per_batch_fused(params, sched, x, t, noise)     # (B,)

    loss_simple = per_batch.mean() * l_simple_weight
    loss_vlb = (sched.lvlb_weights[t] * per_batch).mean()
    loss = loss_simple + original_elbo_weight * loss_vlb
    loss_dict = {"train/loss_simple": loss_simple,
                 "train/loss_vlb": loss_vlb,
                 "train/loss": loss}
    return loss, loss_dict


# --------------------------------------------------------------------------
if __name__ == "__main__":
    B, C, H, W = 2, 4, 16, 16
    TEMB_DIM = 32

    key = jax.random.PRNGKey(0)
    kx, kw1, kw2, kt, kn, kfwd = jax.random.split(key, 6)

    x = jax.random.normal(kx, (B, C, H, W), dtype=jnp.float32)

    sched = DDPMSchedule(timesteps=1000, beta_schedule="scaled_linear",
                         linear_start=1e-4, linear_end=2e-2,
                         parameterization="eps")

    # deterministic synthetic parameters for the toy diffusion-model stand-in
    params = {
        "temb_w": 0.02 * jax.random.normal(kw1, (TEMB_DIM, C), dtype=jnp.float32),
        "temb_b": jnp.zeros((C,), jnp.float32),
        "mix_w": jnp.eye(C, dtype=jnp.float32)
                 + 0.1 * jax.random.normal(kw2, (C, C), dtype=jnp.float32),
    }

    # correctness check of the fused kernel against the pure-JAX reference
    t_chk = jax.random.randint(kt, (B,), 0, sched.num_timesteps)
    noise_chk = jax.random.normal(kn, x.shape, dtype=jnp.float32)
    per_batch = jax.block_until_ready(
        p_losses_per_batch_fused(params, sched, x, t_chk, noise_chk))
    per_batch_ref = p_losses_per_batch_ref(params, sched, x, t_chk, noise_chk)
    assert jnp.allclose(per_batch, per_batch_ref, rtol=1e-4, atol=1e-5), \
        (per_batch, per_batch_ref)

    # full DDPM.forward path
    loss, loss_dict = ddpm_forward(params, sched, x, kfwd)
    loss = jax.block_until_ready(loss)
    assert bool(jnp.isfinite(loss)), "loss is not finite"
    print("KERNEL_OK")
</pallas_src>

<mosaic_0001>
module attributes {stable_mosaic.version = 11 : i64} {
  func.func @kernel(%arg0: i32, %arg1: i32, %arg2: memref<1x4x8xf32, #tpu.memory_space<vmem>>, %arg3: memref<1x4x1xf32, #tpu.memory_space<vmem>>, %arg4: memref<1x8x256xf32, #tpu.memory_space<vmem>>, %arg5: memref<1x1x128xf32, #tpu.memory_space<vmem>>) attributes {dimension_semantics = [#tpu.dimension_semantics<parallel>, #tpu.dimension_semantics<arbitrary>], iteration_bounds = array<i64: 2, 1>, scalar_prefetch = 0 : i64, scratch_operands = 0 : i64, tpu.core_type = #tpu.core_type<tc>, window_params = [{transform_indices = @transform_0, window_bounds = array<i64: 1, 4, 8>}, {transform_indices = @transform_1, window_bounds = array<i64: 1, 4, 1>}, {transform_indices = @transform_2, window_bounds = array<i64: 1, 8, 256>}, {transform_indices = @transform_3, window_bounds = array<i64: 1, 1, 128>}]} {
    %c0_i32 = arith.constant 0 : i32
    %0 = arith.cmpi eq, %arg1, %c0_i32 : i32
    %1 = arith.extui %0 : i1 to i32
    %c0_i32_0 = arith.constant 0 : i32
    %2 = arith.cmpi ne, %1, %c0_i32_0 : i32
    scf.if %2 {
      %cst_18 = arith.constant 0.000000e+00 : f32
      %24 = vector.broadcast %cst_18 : f32 to vector<1x1x128xf32>
      %c0_19 = arith.constant 0 : index
      %c0_20 = arith.constant 0 : index
      %c0_21 = arith.constant 0 : index
      %25 = vector.load %arg5[%c0_19, %c0_20, %c0_21] : memref<1x1x128xf32, #tpu.memory_space<vmem>>, vector<1x1x128xf32>
      tpu.vector_store %arg5[%c0_19, %c0_20, %c0_21], %24 {strides = array<i32>} : memref<1x1x128xf32, #tpu.memory_space<vmem>>, vector<1x1x128xf32>,
    } else {
    }
    %c0 = arith.constant 0 : index
    %c0_1 = arith.constant 0 : index
    %c0_2 = arith.constant 0 : index
    %3 = vector.load %arg2[%c0, %c0_1, %c0_2] : memref<1x4x8xf32, #tpu.memory_space<vmem>>, vector<1x4x8xf32>
    %4 = vector.shape_cast %3 : vector<1x4x8xf32> to vector<4x8xf32>
    %c0_3 = arith.constant 0 : index
    %c0_4 = arith.constant 0 : index
    %c0_5 = arith.constant 0 : index
    %5 = vector.load %arg4[%c0_3, %c0_4, %c0_5] : memref<1x8x256xf32, #tpu.memory_space<vmem>>, vector<1x8x256xf32>
    %6 = vector.shape_cast %5 : vector<1x8x256xf32> to vector<8x256xf32>
    %cst = arith.constant dense<0.000000e+00> : vector<4x256xf32>
    %7 = tpu.matmul %4, %6, %cst {dimension_numbers = #tpu.dot_dimension_numbers<[1], [0], [0], [1], [0, 0, 1, 1], [], []>} : vector<4x8xf32>, vector<8x256xf32>, vector<4x256xf32> -> vector<4x256xf32>
    %c0_6 = arith.constant 0 : index
    %c0_7 = arith.constant 0 : index
    %c0_8 = arith.constant 0 : index
    %8 = vector.load %arg3[%c0_6, %c0_7, %c0_8] : memref<1x4x1xf32, #tpu.memory_space<vmem>>, vector<1x4x1xf32>
    %9 = vector.shape_cast %8 : vector<1x4x1xf32> to vector<4x1xf32>
    %10 = vector.broadcast %9 : vector<4x1xf32> to vector<4x256xf32>
    %11 = arith.addf %7, %10 : vector<4x256xf32>
    %c0_9 = arith.constant 0 : index
    %c0_10 = arith.constant 0 : index
    %c0_11 = arith.constant 0 : index
    %12 = vector.load %arg5[%c0_9, %c0_10, %c0_11] : memref<1x1x128xf32, #tpu.memory_space<vmem>>, vector<1x1x128xf32>
    %13 = arith.mulf %11, %11 : vector<4x256xf32>
    %14 = vector.shape_cast %13 : vector<4x256xf32> to vector<1x4x256xf32>
    %cst_12 = arith.constant dense<0.000000e+00> : vector<1xf32>
    %15 = vector.multi_reduction <add>, %14, %cst_12 [1, 2] : vector<1x4x256xf32> to vector<1xf32>
    %16 = vector.shape_cast %15 : vector<1xf32> to vector<1x1x1xf32>
    %17 = vector.extract %16[0, 0, 0] : f32 from vector<1x1x1xf32>
    %18 = vector.broadcast %17 : f32 to vector<1x1x128xf32>
    %19 = arith.addf %12, %18 : vector<1x1x128xf32>
    %c0_13 = arith.constant 0 : index
    %c0_14 = arith.constant 0 : index
    %c0_15 = arith.constant 0 : index
    %20 = vector.load %arg5[%c0_13, %c0_14, %c0_15] : memref<1x1x128xf32, #tpu.memory_space<vmem>>, vector<1x1x128xf32>
    tpu.vector_store %arg5[%c0_13, %c0_14, %c0_15], %19 {strides = array<i32>} : memref<1x1x128xf32, #tpu.memory_space<vmem>>, vector<1x1x128xf32>,
    %c0_i32_16 = arith.constant 0 : i32
    %21 = arith.cmpi eq, %arg1, %c0_i32_16 : i32
    %22 = arith.extui %21 : i1 to i32
    %c0_i32_17 = arith.constant 0 : i32
    %23 = arith.cmpi ne, %22, %c0_i32_17 : i32
    scf.if %23 {
      %c0_18 = arith.constant 0 : index
      %c0_19 = arith.constant 0 : index
      %c0_20 = arith.constant 0 : index
      %24 = vector.load %arg5[%c0_18, %c0_19, %c0_20] : memref<1x1x128xf32, #tpu.memory_space<vmem>>, vector<1x1x128xf32>
      %cst_21 = arith.constant 9.765625E-4 : f32
      %25 = vector.broadcast %cst_21 : f32 to vector<1x1x128xf32>
      %26 = arith.mulf %24, %25 : vector<1x1x128xf32>
      %c0_22 = arith.constant 0 : index
      %c0_23 = arith.constant 0 : index
      %c0_24 = arith.constant 0 : index
      %27 = vector.load %arg5[%c0_22, %c0_23, %c0_24] : memref<1x1x128xf32, #tpu.memory_space<vmem>>, vector<1x1x128xf32>
      tpu.vector_store %arg5[%c0_22, %c0_23, %c0_24], %26 {strides = array<i32>} : memref<1x1x128xf32, #tpu.memory_space<vmem>>, vector<1x1x128xf32>,
    } else {
    }
    return
  }
  func.func @transform_0(%arg0: i32, %arg1: i32) -> (i32, i32, i32) {
    %c0_i32 = arith.constant 0 : i32
    %c0_i32_0 = arith.constant 0 : i32
    %c0_i32_1 = arith.constant 0 : i32
    return %arg0, %c0_i32, %c0_i32_0 : i32, i32, i32
  }
  func.func @transform_1(%arg0: i32, %arg1: i32) -> (i32, i32, i32) {
    %c0_i32 = arith.constant 0 : i32
    %c0_i32_0 = arith.constant 0 : i32
    %c0_i32_1 = arith.constant 0 : i32
    return %arg0, %c0_i32, %c0_i32_0 : i32, i32, i32
  }
  func.func @transform_2(%arg0: i32, %arg1: i32) -> (i32, i32, i32) {
    %c0_i32 = arith.constant 0 : i32
    %c0_i32_0 = arith.constant 0 : i32
    return %arg0, %c0_i32, %arg1 : i32, i32, i32
  }
  func.func @transform_3(%arg0: i32, %arg1: i32) -> (i32, i32, i32) {
    %c0_i32 = arith.constant 0 : i32
    %c0_i32_0 = arith.constant 0 : i32
    %c0_i32_1 = arith.constant 0 : i32
    return %arg0, %c0_i32, %c0_i32_0 : i32, i32, i32
  }
}

</mosaic_0001>

<bundles_post_ra>
// kernel: tpu_custom_call.1
= control target key start
LH: loop header
LB: loop body
LE: loop exit
PB: predicated region body
PF: predicated region fallthrough
CT: control target
= control target key end

     0   :  { %8 = vsyncpa [#allocation3], 0  ;;  %s784_s0 = inlined_call_operand.vmem [shape: f32[2,4,8], index: 0, kind: input, shape index: {}]   ;;  %s785_s1 = inlined_call_operand.vmem [shape: f32[2,4,1], index: 1, kind: input, shape index: {}]   ;;  %s786_s2 = inlined_call_operand.hbm [shape: f32[2,8,256], index: 2, kind: input, shape index: {}]   ;;  %s787_s3 = inlined_call_operand.hbm [shape: f32[2,1,128], index: 3, kind: output, shape index: {}]  }
   0x1   :  { %10 = vsyncpa [#allocation3 + $0x1], 0 }
   0x2   :  { %11 = vsyncpa [#allocation4], 0 }
   0x3   :  { %13 = vsyncpa [#allocation4 + $0x1], 0  ;;  %s655_s12 = smov 0   ;;  %s657_s13 = smov 0  }
   0x4   :  { %s659_s14 = smov 0   ;;  %s661_s15 = smov 0  }
   0x5   :  { %s663_s16 = smov 0   ;;  %s665_s17 = smov 0  }
   0x6 LB: > { %s436_s18 = sadd.s32 4294967295, %s631_s17   ;;  %s437_s19 = sadd.s32 4294967294, %s631_s17   ;;  %s631_s17 = sphi %s665_s17, %s19_s17   ;;  %s627_s16 = sphi %s663_s16, %s796_s16   ;;  %s623_s15 = sphi %s661_s15, %s795_s15   ;;  %s619_s14 = sphi %s659_s14, %s794_s14   ;;  %s615_s13 = sphi %s657_s13, %s793_s13   ;;  %s611_s12 = sphi %s655_s12, %s792_s12  }
   0x7   : > { %s31_s20 = sadd.s32 1, %s627_s16  ;;  %s92_s21 = sadd.s32 1, %s619_s14 }
   0x8   : > { %p33_p0 = scmp.ge.s32.totalorder %s31_s20, 2  ;;  %p99_p1 = scmp.ne.s32.totalorder %s619_s14, %s615_s13 }
   0x9   : > { %p100_p2 = scmp.eq.s32.totalorder %s631_s17, 0  ;;  %p105_p3 = scmp.ne.s32.totalorder %s615_s13, %s611_s12 }
   0xa   : > { %s798_s20 = smov (%p33_p0, %s31_s20), 0  ;;  %p106_p5 = scmp.eq.s32.totalorder %s436_s18, 0 }
   0xb   : > { %p696_p4 = por %p100_p2, %p99_p1  ;;  %s87_s23 = ssub.s32 %s627_s16, %s798_s20 }
   0xc   : > { %p129_p6 = scmp.eq.s32.totalorder %s436_s18, 1  ;;  %p90_p7 = scmp.eq.s32.totalorder %s87_s23, 0 }
   0xd   : > { %p702_p8 = por %p106_p5, %p105_p3  ;;  %p135_p10 = scmp.eq.s32.totalorder %s437_s19, 1 }
   0xe   : > { %p706_p9 = por %p129_p6, %p99_p1  ;;  %p439_p12 = scmp.ge.s32.totalorder %s631_s17, 2 }
   0xf   : > { %s711_s26 = scalar_select %p90_p7, %s619_s14, %s92_s21  }
  0x10   : > { %p713_p11 = por %p135_p10, %p105_p3  ;;  %p466_p13 = scmp.lt.s32.totalorder %s631_s17, 2 }
  0x11   : > { %s169_s28 = sand.u32 1, %s619_s14   ;;  %s451_s30 = sshll.u32 %s627_s16, 4 }
  0x12   : > { %s440_s29 = sshll.u32 %s169_s28, 4  ;;  %s180_s6 = scalar_lea.hbm %s786_s2, %s451_s30 }
  0x13   : > { %s173_s7 = scalar_lea.vmem [#allocation2], %s440_s29  ;;  %s182_s9 = sshll.u32 %s180_s6, 4  ;;  %s183_s9 = int_to_ptr.hbm [resolvable:$true] %s182_s9 }
  0x14   : > { %s184_s8 = sshll.u32 %s173_s7, 4  ;;  %p459_p0 = pnand %p466_p13, %p696_p4  ;;  %s185_s8 = int_to_ptr.vmem [resolvable:$true] %s184_s8 }
  0x15   : > { %p443_p1 = scmp.ge.s32.totalorder %s631_s17, 1  ;;  %p189_p2 = scmp.lt.s32.totalorder %s631_s17, 3 }
  0x16   : > { %s170_s10 = scalar_lea.sflag [#allocation3], %s169_s28 }
  0x17   : > { %461 = dma.hbm_to_vmem [thread:$0]  (!%p459_p0), %s183_s9, 256, %s185_s8, %s170_s10  }
  0x18   : > { %p190_p3 = pnand %p443_p1, %p189_p2 }
  0x19   : > { %s729_s11 = sand.u32 (!%p190_p3), 1, %s615_s13  }
  0x1a   : > { %193 = sbr.rel (%p190_p3) target bundleno = 366 (0x16e), region = 32  ;;  %s444_s18 = sshll.u32 (!%p190_p3), %s729_s11, 4 }
  0x1b   : > { %s196_s19 = scalar_lea.sflag (!%p190_p3), [#allocation3], %s729_s11  ;;  %s199_s21 = scalar_lea.vmem (!%p190_p3), [#allocation2], %s444_s18 }
  0x1f   : > { %602 = dma.done.wait (%p702_p8), %s196_s19, 256  }
  0x20   : > { %604 = vsyncadd (%p702_p8), %s196_s19, 4294967040  ;;  %p230_p4 = scmp.lt.s32.totalorder %s623_s15, 1  ;;  %v633_v0 = vmov 0   ;;  %vm253_vm0 = vcmask 64512   ;;  %v245_v1 = vld [vmem:[%s199_s21] sm:$0xff]  ;;  %v246_v2 = vld [vmem:[%s199_s21 + $0x8] sm:$0xff]  ;;  %s331_s10 = scalar_lea.hbm %s787_s3, %s623_s15 }
  0x21   : > { %518 = vset.pattern.permute.xlu0 %v633_v0  ;;  %272 = vmatpush.msra.mxu0 %v245_v1  ;;  %vm300_vm1 = vcmask 1043456   ;;  %s229_s24 = scalar_lea.vmem [#allocation5], %s729_s11  ;;  %v634_v15 = vmov 0.0   ;;  %s335_s19 = sshll.u32 %s331_s10, 4  ;;  %s336_s19 = int_to_ptr.hbm [resolvable:$true] %s335_s19 }
  0x22   : > { %s231_s22 = scalar_select %p230_p4, %s623_s15, 1  ;;  %292 = vmatpush.msra.mxu1 %v246_v2  ;;  %243 = vst [vmem:[%s229_s24] sm:$0x1] %v634_v15 }
  0x23   : > { %s333_s18 = sshll.u32 %s229_s24, 4  ;;  %s323_s21 = scalar_lea.sflag [#allocation4], %s729_s11  ;;  %s334_s18 = int_to_ptr.vmem [resolvable:$true] %s333_s18 }
  0x24   : > { %s445_s23 = sshll.u32 %s231_s22, 2  ;;  %s563_s22 = sshra.s32 %s336_s19, 4  ;;  %s564_s22 = int_to_ptr.hbm [resolvable:$true] %s563_s22 }
  0x25   : > { %s233_s30 = scalar_lea.vmem %s784_s0, %s445_s23  ;;  %s237_s6 = scalar_lea.vmem %s785_s1, %s445_s23 }
  0x26   : > { %v244_v3 = vld [vmem:[%s233_s30] sm:$0xf]  ;;  %s565_s23 = scalar_lea.hbm %s564_s22, 1  ;;  %s569_s30 = scalar_lea.hbm %s787_s3, 2 }
  0x27   : > { %v247_v4 = vld [vmem:[%s237_s6] sm:$0xf]  ;;  %447 = vmatmul.msk.f32.vlgmr.msra.gmra.mxu0 %vm253_vm0, %v244_v3  ;;  %448 = vmatmul.msk.f32.vlgmr.msra.gmra.mxu1 %vm253_vm0, %v244_v3  ;;  %p566_p5 = scmp.ne.s32.totalorder %s564_s22, %s565_s23  ;;  %p570_p8 = scmp.lt.s32.totalorder %s564_s22, %s787_s3 }
  0x28   : > { %250 = vperm.xlu0 %518, %v247_v4   ;;  %p571_p10 = scmp.lt.s32.totalorder %s569_s30, %s565_s23 }
  0x29   : > { %v297_v23 = vld [vmem:[%s229_s24] sm:$0x1]  ;;  %p567_p6 = pnand %p566_p5, %p706_p9 }
  0x2a   : > { %p572_p13 = por %p571_p10, %p570_p8 }
  0x2b   : > { %p568_p7 = pneg %p567_p6 }
  0x2d   : > { %p573_p0 = pnand %p572_p13, %p568_p7 }
  0x9a   : > { %v251_v5 = vpop.permute.xlu0 %250 }
  0xa4   : > { %v274_v6 = vpop.f32.mrf.mxu0  ;;  %v294_v7 = vpop.f32.mrf.mxu1 }
  0xa5   : > { %v275_v8 = vadd.f32 %v274_v6, %v251_v5  ;;  %v295_v9 = vadd.f32 %v294_v7, %v251_v5 }
  0xa7   : > { %v298_v10 = vmul.f32 %v275_v8, %v275_v8  ;;  %v299_v11 = vmul.f32 %v295_v9, %v295_v9 }
  0xa9   : > { %v301_v12 = vsel %vm300_vm1, %v298_v10, 0.0  ;;  %v302_v13 = vsel %vm300_vm1, %v299_v11, 0.0 }
  0xaa   : > { %v303_v14 = vadd.f32 %v302_v13, %v301_v12 }
  0xac   : > { %304 = vadd.xlane.f32.xlu0 %v303_v14 }
 0x11f   : > { %v305_v16 = vpop.xlane.xlu0 %304 }
 0x120   : > { %v306_v17 = vrot.slane %v305_v16, 4 }
 0x122   : > { %v307_v18 = vadd.f32 %v306_v17, %v305_v16 }
 0x124   : > { %v308_v19 = vrot.slane %v307_v18, 2 }
 0x126   : > { %v309_v20 = vadd.f32 %v308_v19, %v307_v18 }
 0x128   : > { %v310_v21 = vrot.slane %v309_v20, 1 }
 0x12a   : > { %v311_v22 = vadd.f32 %v310_v21, %v309_v20 }
 0x12c   : > { %452 = vpush %v311_v22 }
 0x15d   : > { %s453_s7 = spop %452 }
 0x15e   : > { %v313_v24 = vstv %s453_s7 }
 0x15f   : > { %v314_v25 = vadd.f32 %v313_v24, %v297_v23 }
 0x161   : > { %315 = vst [vmem:[%s229_s24] sm:$0x1] %v314_v25 }
 0x168   : > { %v319_v26 = vld [vmem:[%s229_s24] sm:$0x1] }
 0x169   : > { %v320_v27 = vmul.f32 0.0009765625, %v319_v26 }
 0x16b   : > { %321 = vst [vmem:[%s229_s24] sm:$0x1] %v320_v27 }
 0x16c   : > { %576 = shalt.err (!%p573_p0)
}
 0x16d   : > { %456 = dma.vmem_to_hbm [thread:$0]  (%p706_p9), %s334_s18, 16, %s336_s19, %s323_s21  }
 0x16e PF: > { %s347_s11 = sand.u32 1, %s611_s12   ;;  %p463_p1 = pnand %p439_p12, %p713_p11 }
 0x16f   : > { %s348_s5 = scalar_lea.sflag [#allocation4], %s347_s11 }
 0x170   : > { %p464_p2 = pneg %p463_p1 }
 0x172   : > { %606 = dma.done.wait (%p464_p2), %s348_s5, 16  }
 0x173   : > { %608 = vsyncadd (%p464_p2), %s348_s5, 4294967280  ;;  %s19_s17 = sadd.s32 1, %s631_s17   ;;  %s792_s12 = smov %s615_s13 }
 0x174   : > { %p16_p3 = scmp.ge.s32.totalorder %s19_s17, 4   ;;  %s793_s13 = smov %s619_s14 }
 0x175   : > { %s794_s14 = smov %s711_s26  ;;  %s795_s15 = smov %s627_s16 }
 0x176   : > { %s796_s16 = smov %s798_s20  ;;  %18 = sbr.rel (!%p16_p3) target bundleno = 6 (0x6), region = 91 }
 0x17b   :  { %353 = vsyncpa [#allocation3], 1 }
 0x17c   :  { %355 = vsyncpa [#allocation3 + $0x1], 1 }
 0x17d   :  { %356 = vsyncpa [#allocation4], 1 }
 0x17e   :  { %358 = vsyncpa [#allocation4 + $0x1], 1 }

</bundles_post_ra>
